<compile_context>
chip_gen: v5e
topology: v5e:2x2
jax: 0.10.0
libtpu: 0.0.40
codegen_flags: <defaults>
</compile_context>

<pallas_src>
import functools

import jax
import jax.numpy as jnp
from jax.experimental import pallas as pl
from jax.experimental.pallas import tpu as pltpu


def _round_up(n, m):
    return ((n + m - 1) // m) * m


def _fnn_fused_kernel(*refs, n_layers, mxu_dtype):
    """refs = (x_ref, w1, b1, w2, b2, ..., wn, bn, o_ref).

    Computes the whole MLP for one batch tile; hidden activations stay in
    vregs/VMEM (never round-trip through HBM).  Matmuls use mxu_dtype
    (bf16) operands with f32 accumulation; bias add and tanh are f32.
    """
    x_ref = refs[0]
    o_ref = refs[-1]
    wb = refs[1:-1]

    h = x_ref[...].astype(jnp.float32)
    for i in range(n_layers):
        w = wb[2 * i][...]                             # (d_in, d_out), mxu_dtype
        b = wb[2 * i + 1][...].astype(jnp.float32)     # (1, d_out) -> broadcast
        h = jnp.dot(h.astype(mxu_dtype), w,
                    preferred_element_type=jnp.float32) + b
        if i < n_layers - 1:
            h = jnp.tanh(h)                            # EUP; final layer linear
    o_ref[...] = h.astype(o_ref.dtype)


def prepare_params(params, mxu_dtype=jnp.bfloat16):
    """One-time weight prep (hoisted out of the per-call path).

    params: list of (w, b) with w: (in, out), b: (out,) or (1, out), f32.
    Returns weights cast to the MXU operand dtype and biases as (1, out) f32.
    """
    prepared = []
    for w, b in params:
        prepared.append((jnp.asarray(w, mxu_dtype),
                         jnp.asarray(b, jnp.float32).reshape(1, -1)))
    return prepared


def fnn_forward(x, params, *, tile_b=None):
    """Mirrors FNN.forward: tanh after every layer except the last.

    x:      (batch, in_features)
    params: output of prepare_params -- list of (w (in,out) bf16, b (1,out) f32)
    """
    batch, d_in = x.shape
    n_layers = len(params)
    dims = [d_in] + [int(w.shape[1]) for (w, _) in params]
    mxu_dtype = params[0][0].dtype
    out_dtype = x.dtype
    itemsize_x = jnp.dtype(x.dtype).itemsize
    itemsize_o = jnp.dtype(out_dtype).itemsize

    # Sublane-aligned batch tile; no batch padding — partial last tile is fine
    # because rows are independent.  A tile covering the whole batch may use
    # the exact (full-dim) batch size.
    if tile_b is None:
        tile_b = 512
    tile_b = max(8, _round_up(int(tile_b), 8))
    if tile_b >= batch:
        tile_b = batch
    grid = (pl.cdiv(batch, tile_b),)

    flat_wb = []
    for w, b in params:
        flat_wb.extend([w, b])

    # --- VMEM budget (resident weights + double-buffered x/out + act margin).
    weight_bytes = sum(int(w.size) * w.dtype.itemsize +
                       int(b.size) * b.dtype.itemsize for (w, b) in params)
    io_bytes = 2 * tile_b * (dims[0] * itemsize_x + dims[-1] * itemsize_o)
    act_bytes = 4 * tile_b * max(dims) * 4          # f32 working activations
    needed = 2 * weight_bytes + io_bytes + act_bytes
    vmem_limit = int(min(48 << 20, max(needed + (8 << 20), 32 << 20)))

    # --- Advisory cost estimate with TRUE (unpadded) dims.
    flops = 2 * batch * sum(dims[i] * dims[i + 1] for i in range(n_layers))
    transcendentals = batch * sum(dims[1:-1])
    bytes_accessed = (batch * dims[0] * itemsize_x +
                      batch * dims[-1] * itemsize_o + weight_bytes)

    kernel = functools.partial(_fnn_fused_kernel, n_layers=n_layers,
                               mxu_dtype=mxu_dtype)

    def build(single_buffer_weights):
        in_specs = [pl.BlockSpec((tile_b, dims[0]), lambda i: (i, 0))]
        for li in range(n_layers):
            kw = {}
            if single_buffer_weights:
                # Constant index_map -> fetched once; no need to double-buffer.
                kw["pipeline_mode"] = pl.Buffered(1)
            in_specs.append(pl.BlockSpec((dims[li], dims[li + 1]),
                                         lambda i: (0, 0), **kw))
            in_specs.append(pl.BlockSpec((1, dims[li + 1]),
                                         lambda i: (0, 0), **kw))
        out_spec = pl.BlockSpec((tile_b, dims[-1]), lambda i: (i, 0))
        return pl.pallas_call(
            kernel,
            out_shape=jax.ShapeDtypeStruct((batch, dims[-1]), out_dtype),
            grid_spec=pltpu.PrefetchScalarGridSpec(
                num_scalar_prefetch=0,
                grid=grid,
                in_specs=in_specs,
                out_specs=out_spec,
            ),
            compiler_params=pltpu.CompilerParams(
                dimension_semantics=("parallel",),   # megacore sharding on v7x
                vmem_limit_bytes=vmem_limit,
            ),
            cost_estimate=pl.CostEstimate(
                flops=flops,
                transcendentals=transcendentals,
                bytes_accessed=bytes_accessed,
            ),
        )

    try:
        return build(single_buffer_weights=True)(x, *flat_wb)
    except Exception:
        # pl.Buffered(1) not supported on this JAX/Mosaic version ->
        # fall back to default double-buffered weight specs.
        return build(single_buffer_weights=False)(x, *flat_wb)


def init_params(key, layers, dtype=jnp.float32):
    """Deterministic init matching nn.Linear shapes (uniform +-1/sqrt(fan_in)).

    Weights stored as (in, out) so the kernel computes y = x @ W + b
    (equivalent to PyTorch's x @ W.T + b with W of shape (out, in)).
    """
    params = []
    for l in range(1, len(layers)):
        fan_in, fan_out = layers[l - 1], layers[l]
        key, kw, kb = jax.random.split(key, 3)
        bound = float(1.0 / (fan_in ** 0.5))
        w = jax.random.uniform(kw, (fan_in, fan_out), dtype, -bound, bound)
        b = jax.random.uniform(kb, (1, fan_out), dtype, -bound, bound)
        params.append((w, b))
    return params


if __name__ == "__main__":
    layers = [16, 32, 32, 8]   # FNN([16, 32, 32, 8]) -> 3 Linear layers
    batch = 4

    key = jax.random.PRNGKey(0)
    key, kx = jax.random.split(key)
    x = jax.random.normal(kx, (batch, layers[0]), jnp.float32)
    params = init_params(key, layers)

    # One-time weight preparation (bf16 MXU operands), hoisted out of the
    # per-forward-call path.
    prepared = prepare_params(params)

    out = fnn_forward(x, prepared)
    jax.block_until_ready(out)
    assert out.shape == (batch, layers[-1])

    # Reference 1: identical bf16-operand / f32-accumulate math (tight check).
    ref = x
    for i, (w, b) in enumerate(prepared):
        ref = jnp.dot(ref.astype(w.dtype), w,
                      preferred_element_type=jnp.float32) + b
        if i < len(prepared) - 1:
            ref = jnp.tanh(ref)
    assert jnp.allclose(out, ref, atol=1e-3, rtol=1e-3)

    # Reference 2: the original full-f32 module semantics (loose tolerance,
    # difference is only the bf16 MXU operand cast).
    ref32 = x
    for i, (w, b) in enumerate(params):
        ref32 = ref32 @ w + b.reshape(1, -1)
        if i < len(params) - 1:
            ref32 = jnp.tanh(ref32)
    assert jnp.allclose(out, ref32, atol=5e-2, rtol=5e-2)

    print("KERNEL_OK")
</pallas_src>

<mosaic_0001>
module attributes {stable_mosaic.version = 11 : i64} {
  func.func @_fnn_fused_kernel(%arg0: i32, %arg1: memref<4x16xf32, #tpu.memory_space<vmem>>, %arg2: memref<16x32xbf16, #tpu.memory_space<vmem>>, %arg3: memref<1x32xf32, #tpu.memory_space<vmem>>, %arg4: memref<32x32xbf16, #tpu.memory_space<vmem>>, %arg5: memref<1x32xf32, #tpu.memory_space<vmem>>, %arg6: memref<32x8xbf16, #tpu.memory_space<vmem>>, %arg7: memref<1x8xf32, #tpu.memory_space<vmem>>, %arg8: memref<4x8xf32, #tpu.memory_space<vmem>>) attributes {dimension_semantics = [#tpu.dimension_semantics<parallel>], iteration_bounds = array<i64: 1>, scalar_prefetch = 0 : i64, scratch_operands = 0 : i64, tpu.core_type = #tpu.core_type<tc>, window_params = [{transform_indices = @transform_0, window_bounds = array<i64: 4, 16>}, {pipeline_mode = #tpu.pipeline_mode<synchronous>, transform_indices = @transform_1, window_bounds = array<i64: 16, 32>}, {pipeline_mode = #tpu.pipeline_mode<synchronous>, transform_indices = @transform_2, window_bounds = array<i64: 1, 32>}, {pipeline_mode = #tpu.pipeline_mode<synchronous>, transform_indices = @transform_3, window_bounds = array<i64: 32, 32>}, {pipeline_mode = #tpu.pipeline_mode<synchronous>, transform_indices = @transform_4, window_bounds = array<i64: 1, 32>}, {pipeline_mode = #tpu.pipeline_mode<synchronous>, transform_indices = @transform_5, window_bounds = array<i64: 32, 8>}, {pipeline_mode = #tpu.pipeline_mode<synchronous>, transform_indices = @transform_6, window_bounds = array<i64: 1, 8>}, {transform_indices = @transform_7, window_bounds = array<i64: 4, 8>}]} {
    %c0 = arith.constant 0 : index
    %c0_0 = arith.constant 0 : index
    %0 = vector.load %arg1[%c0, %c0_0] : memref<4x16xf32, #tpu.memory_space<vmem>>, vector<4x16xf32>
    %c0_1 = arith.constant 0 : index
    %c0_2 = arith.constant 0 : index
    %1 = vector.load %arg2[%c0_1, %c0_2] : memref<16x32xbf16, #tpu.memory_space<vmem>>, vector<16x32xbf16>
    %c0_3 = arith.constant 0 : index
    %c0_4 = arith.constant 0 : index
    %2 = vector.load %arg3[%c0_3, %c0_4] : memref<1x32xf32, #tpu.memory_space<vmem>>, vector<1x32xf32>
    %3 = arith.truncf %0 : vector<4x16xf32> to vector<4x16xbf16>
    %cst = arith.constant dense<0.000000e+00> : vector<4x32xf32>
    %4 = tpu.matmul %3, %1, %cst {dimension_numbers = #tpu.dot_dimension_numbers<[1], [0], [0], [1], [0, 0, 1, 1], [], []>} : vector<4x16xbf16>, vector<16x32xbf16>, vector<4x32xf32> -> vector<4x32xf32>
    %5 = vector.broadcast %2 : vector<1x32xf32> to vector<4x32xf32>
    %6 = arith.addf %4, %5 : vector<4x32xf32>
    %7 = math.tanh %6 : vector<4x32xf32>
    %c0_5 = arith.constant 0 : index
    %c0_6 = arith.constant 0 : index
    %8 = vector.load %arg4[%c0_5, %c0_6] : memref<32x32xbf16, #tpu.memory_space<vmem>>, vector<32x32xbf16>
    %c0_7 = arith.constant 0 : index
    %c0_8 = arith.constant 0 : index
    %9 = vector.load %arg5[%c0_7, %c0_8] : memref<1x32xf32, #tpu.memory_space<vmem>>, vector<1x32xf32>
    %10 = arith.truncf %7 : vector<4x32xf32> to vector<4x32xbf16>
    %cst_9 = arith.constant dense<0.000000e+00> : vector<4x32xf32>
    %11 = tpu.matmul %10, %8, %cst_9 {dimension_numbers = #tpu.dot_dimension_numbers<[1], [0], [0], [1], [0, 0, 1, 1], [], []>} : vector<4x32xbf16>, vector<32x32xbf16>, vector<4x32xf32> -> vector<4x32xf32>
    %12 = vector.broadcast %9 : vector<1x32xf32> to vector<4x32xf32>
    %13 = arith.addf %11, %12 : vector<4x32xf32>
    %14 = math.tanh %13 : vector<4x32xf32>
    %c0_10 = arith.constant 0 : index
    %c0_11 = arith.constant 0 : index
    %15 = vector.load %arg6[%c0_10, %c0_11] : memref<32x8xbf16, #tpu.memory_space<vmem>>, vector<32x8xbf16>
    %c0_12 = arith.constant 0 : index
    %c0_13 = arith.constant 0 : index
    %16 = vector.load %arg7[%c0_12, %c0_13] : memref<1x8xf32, #tpu.memory_space<vmem>>, vector<1x8xf32>
    %17 = arith.truncf %14 : vector<4x32xf32> to vector<4x32xbf16>
    %cst_14 = arith.constant dense<0.000000e+00> : vector<4x8xf32>
    %18 = tpu.matmul %17, %15, %cst_14 {dimension_numbers = #tpu.dot_dimension_numbers<[1], [0], [0], [1], [0, 0, 1, 1], [], []>} : vector<4x32xbf16>, vector<32x8xbf16>, vector<4x8xf32> -> vector<4x8xf32>
    %19 = vector.broadcast %16 : vector<1x8xf32> to vector<4x8xf32>
    %20 = arith.addf %18, %19 : vector<4x8xf32>
    %c0_15 = arith.constant 0 : index
    %c0_16 = arith.constant 0 : index
    %21 = vector.load %arg8[%c0_15, %c0_16] : memref<4x8xf32, #tpu.memory_space<vmem>>, vector<4x8xf32>
    tpu.vector_store %arg8[%c0_15, %c0_16], %20 {strides = array<i32>} : memref<4x8xf32, #tpu.memory_space<vmem>>, vector<4x8xf32>,
    return
  }
  func.func @transform_0(%arg0: i32) -> (i32, i32) {
    %c0_i32 = arith.constant 0 : i32
    %c0_i32_0 = arith.constant 0 : i32
    return %arg0, %c0_i32 : i32, i32
  }
  func.func @transform_1(%arg0: i32) -> (i32, i32) {
    %c0_i32 = arith.constant 0 : i32
    %c0_i32_0 = arith.constant 0 : i32
    %c0_i32_1 = arith.constant 0 : i32
    return %c0_i32, %c0_i32_0 : i32, i32
  }
  func.func @transform_2(%arg0: i32) -> (i32, i32) {
    %c0_i32 = arith.constant 0 : i32
    %c0_i32_0 = arith.constant 0 : i32
    %c0_i32_1 = arith.constant 0 : i32
    return %c0_i32, %c0_i32_0 : i32, i32
  }
  func.func @transform_3(%arg0: i32) -> (i32, i32) {
    %c0_i32 = arith.constant 0 : i32
    %c0_i32_0 = arith.constant 0 : i32
    %c0_i32_1 = arith.constant 0 : i32
    return %c0_i32, %c0_i32_0 : i32, i32
  }
  func.func @transform_4(%arg0: i32) -> (i32, i32) {
    %c0_i32 = arith.constant 0 : i32
    %c0_i32_0 = arith.constant 0 : i32
    %c0_i32_1 = arith.constant 0 : i32
    return %c0_i32, %c0_i32_0 : i32, i32
  }
  func.func @transform_5(%arg0: i32) -> (i32, i32) {
    %c0_i32 = arith.constant 0 : i32
    %c0_i32_0 = arith.constant 0 : i32
    %c0_i32_1 = arith.constant 0 : i32
    return %c0_i32, %c0_i32_0 : i32, i32
  }
  func.func @transform_6(%arg0: i32) -> (i32, i32) {
    %c0_i32 = arith.constant 0 : i32
    %c0_i32_0 = arith.constant 0 : i32
    %c0_i32_1 = arith.constant 0 : i32
    return %c0_i32, %c0_i32_0 : i32, i32
  }
  func.func @transform_7(%arg0: i32) -> (i32, i32) {
    %c0_i32 = arith.constant 0 : i32
    %c0_i32_0 = arith.constant 0 : i32
    return %arg0, %c0_i32 : i32, i32
  }
}

module attributes {stable_mosaic.version = 11 : i64} {
  func.func @_fnn_fused_kernel(%arg0: i32, %arg1: memref<4x16xf32, #tpu.memory_space<vmem>>, %arg2: memref<16x32xbf16, #tpu.memory_space<vmem>>, %arg3: memref<1x32xf32, #tpu.memory_space<vmem>>, %arg4: memref<32x32xbf16, #tpu.memory_space<vmem>>, %arg5: memref<1x32xf32, #tpu.memory_space<vmem>>, %arg6: memref<32x8xbf16, #tpu.memory_space<vmem>>, %arg7: memref<1x8xf32, #tpu.memory_space<vmem>>, %arg8: memref<4x8xf32, #tpu.memory_space<vmem>>) attributes {dimension_semantics = [#tpu.dimension_semantics<parallel>], iteration_bounds = array<i64: 1>, scalar_prefetch = 0 : i64, scratch_operands = 0 : i64, tpu.core_type = #tpu.core_type<tc>, window_params = [{transform_indices = @transform_0, window_bounds = array<i64: 4, 16>}, {pipeline_mode = #tpu.pipeline_mode<synchronous>, transform_indices = @transform_1, window_bounds = array<i64: 16, 32>}, {pipeline_mode = #tpu.pipeline_mode<synchronous>, transform_indices = @transform_2, window_bounds = array<i64: 1, 32>}, {pipeline_mode = #tpu.pipeline_mode<synchronous>, transform_indices = @transform_3, window_bounds = array<i64: 32, 32>}, {pipeline_mode = #tpu.pipeline_mode<synchronous>, transform_indices = @transform_4, window_bounds = array<i64: 1, 32>}, {pipeline_mode = #tpu.pipeline_mode<synchronous>, transform_indices = @transform_5, window_bounds = array<i64: 32, 8>}, {pipeline_mode = #tpu.pipeline_mode<synchronous>, transform_indices = @transform_6, window_bounds = array<i64: 1, 8>}, {transform_indices = @transform_7, window_bounds = array<i64: 4, 8>}]} {
    %c0 = arith.constant 0 : index
    %c0_0 = arith.constant 0 : index
    %0 = vector.load %arg1[%c0, %c0_0] : memref<4x16xf32, #tpu.memory_space<vmem>>, vector<4x16xf32>
    %c0_1 = arith.constant 0 : index
    %c0_2 = arith.constant 0 : index
    %1 = vector.load %arg2[%c0_1, %c0_2] : memref<16x32xbf16, #tpu.memory_space<vmem>>, vector<16x32xbf16>
    %c0_3 = arith.constant 0 : index
    %c0_4 = arith.constant 0 : index
    %2 = vector.load %arg3[%c0_3, %c0_4] : memref<1x32xf32, #tpu.memory_space<vmem>>, vector<1x32xf32>
    %3 = arith.truncf %0 : vector<4x16xf32> to vector<4x16xbf16>
    %cst = arith.constant dense<0.000000e+00> : vector<4x32xf32>
    %4 = tpu.matmul %3, %1, %cst {dimension_numbers = #tpu.dot_dimension_numbers<[1], [0], [0], [1], [0, 0, 1, 1], [], []>} : vector<4x16xbf16>, vector<16x32xbf16>, vector<4x32xf32> -> vector<4x32xf32>
    %5 = vector.broadcast %2 : vector<1x32xf32> to vector<4x32xf32>
    %6 = arith.addf %4, %5 : vector<4x32xf32>
    %7 = math.tanh %6 : vector<4x32xf32>
    %c0_5 = arith.constant 0 : index
    %c0_6 = arith.constant 0 : index
    %8 = vector.load %arg4[%c0_5, %c0_6] : memref<32x32xbf16, #tpu.memory_space<vmem>>, vector<32x32xbf16>
    %c0_7 = arith.constant 0 : index
    %c0_8 = arith.constant 0 : index
    %9 = vector.load %arg5[%c0_7, %c0_8] : memref<1x32xf32, #tpu.memory_space<vmem>>, vector<1x32xf32>
    %10 = arith.truncf %7 : vector<4x32xf32> to vector<4x32xbf16>
    %cst_9 = arith.constant dense<0.000000e+00> : vector<4x32xf32>
    %11 = tpu.matmul %10, %8, %cst_9 {dimension_numbers = #tpu.dot_dimension_numbers<[1], [0], [0], [1], [0, 0, 1, 1], [], []>} : vector<4x32xbf16>, vector<32x32xbf16>, vector<4x32xf32> -> vector<4x32xf32>
    %12 = vector.broadcast %9 : vector<1x32xf32> to vector<4x32xf32>
    %13 = arith.addf %11, %12 : vector<4x32xf32>
    %14 = math.tanh %13 : vector<4x32xf32>
    %c0_10 = arith.constant 0 : index
    %c0_11 = arith.constant 0 : index
    %15 = vector.load %arg6[%c0_10, %c0_11] : memref<32x8xbf16, #tpu.memory_space<vmem>>, vector<32x8xbf16>
    %c0_12 = arith.constant 0 : index
    %c0_13 = arith.constant 0 : index
    %16 = vector.load %arg7[%c0_12, %c0_13] : memref<1x8xf32, #tpu.memory_space<vmem>>, vector<1x8xf32>
    %17 = arith.truncf %14 : vector<4x32xf32> to vector<4x32xbf16>
    %cst_14 = arith.constant dense<0.000000e+00> : vector<4x8xf32>
    %18 = tpu.matmul %17, %15, %cst_14 {dimension_numbers = #tpu.dot_dimension_numbers<[1], [0], [0], [1], [0, 0, 1, 1], [], []>} : vector<4x32xbf16>, vector<32x8xbf16>, vector<4x8xf32> -> vector<4x8xf32>
    %19 = vector.broadcast %16 : vector<1x8xf32> to vector<4x8xf32>
    %20 = arith.addf %18, %19 : vector<4x8xf32>
    %c0_15 = arith.constant 0 : index
    %c0_16 = arith.constant 0 : index
    %21 = vector.load %arg8[%c0_15, %c0_16] : memref<4x8xf32, #tpu.memory_space<vmem>>, vector<4x8xf32>
    tpu.vector_store %arg8[%c0_15, %c0_16], %20 {strides = array<i32>} : memref<4x8xf32, #tpu.memory_space<vmem>>, vector<4x8xf32>,
    return
  }
  func.func @transform_0(%arg0: i32) -> (i32, i32) {
    %c0_i32 = arith.constant 0 : i32
    %c0_i32_0 = arith.constant 0 : i32
    return %arg0, %c0_i32 : i32, i32
  }
  func.func @transform_1(%arg0: i32) -> (i32, i32) {
    %c0_i32 = arith.constant 0 : i32
    %c0_i32_0 = arith.constant 0 : i32
    %c0_i32_1 = arith.constant 0 : i32
    return %c0_i32, %c0_i32_0 : i32, i32
  }
  func.func @transform_2(%arg0: i32) -> (i32, i32) {
    %c0_i32 = arith.constant 0 : i32
    %c0_i32_0 = arith.constant 0 : i32
    %c0_i32_1 = arith.constant 0 : i32
    return %c0_i32, %c0_i32_0 : i32, i32
  }
  func.func @transform_3(%arg0: i32) -> (i32, i32) {
    %c0_i32 = arith.constant 0 : i32
    %c0_i32_0 = arith.constant 0 : i32
    %c0_i32_1 = arith.constant 0 : i32
    return %c0_i32, %c0_i32_0 : i32, i32
  }
  func.func @transform_4(%arg0: i32) -> (i32, i32) {
    %c0_i32 = arith.constant 0 : i32
    %c0_i32_0 = arith.constant 0 : i32
    %c0_i32_1 = arith.constant 0 : i32
    return %c0_i32, %c0_i32_0 : i32, i32
  }
  func.func @transform_5(%arg0: i32) -> (i32, i32) {
    %c0_i32 = arith.constant 0 : i32
    %c0_i32_0 = arith.constant 0 : i32
    %c0_i32_1 = arith.constant 0 : i32
    return %c0_i32, %c0_i32_0 : i32, i32
  }
  func.func @transform_6(%arg0: i32) -> (i32, i32) {
    %c0_i32 = arith.constant 0 : i32
    %c0_i32_0 = arith.constant 0 : i32
    %c0_i32_1 = arith.constant 0 : i32
    return %c0_i32, %c0_i32_0 : i32, i32
  }
  func.func @transform_7(%arg0: i32) -> (i32, i32) {
    %c0_i32 = arith.constant 0 : i32
    %c0_i32_0 = arith.constant 0 : i32
    return %arg0, %c0_i32 : i32, i32
  }
}

</mosaic_0001>

<bundles_post_ra>
// kernel: tpu_custom_call.1
= control target key start
LH: loop header
LB: loop body
LE: loop exit
PB: predicated region body
PF: predicated region fallthrough
CT: control target
= control target key end

     0   :  { %12 = vsyncpa [#allocation3], 0  ;;  %s418_s0 = inlined_call_operand.vmem [shape: f32[4,16], index: 0, kind: input, shape index: {}]   ;;  %s419_s1 = inlined_call_operand.hbm [shape: bf16[16,32], index: 1, kind: input, shape index: {}]   ;;  %s420_s2 = inlined_call_operand.hbm [shape: f32[1,32], index: 2, kind: input, shape index: {}]   ;;  %s421_s3 = inlined_call_operand.vmem [shape: bf16[32,32], index: 3, kind: input, shape index: {}]   ;;  %s422_s4 = inlined_call_operand.hbm [shape: f32[1,32], index: 4, kind: input, shape index: {}]   ;;  %s423_s5 = inlined_call_operand.vmem [shape: bf16[32,8], index: 5, kind: input, shape index: {}]   ;;  %s424_s6 = inlined_call_operand.vmem [shape: f32[1,8], index: 6, kind: input, shape index: {}]   ;;  %s425_s7 = inlined_call_operand.hbm [shape: f32[4,8], index: 7, kind: output, shape index: {}]  }
   0x1   :  { %13 = vsyncpa [#allocation6], 0  ;;  %s35_s26 = sshll.u32 %s420_s2, 4  ;;  %s36_s26 = int_to_ptr.hbm [resolvable:$true] %s35_s26 }
   0x2   :  { %14 = vsyncpa [#allocation4], 0  ;;  %s342_s27 = smov [#allocation5]   ;;  %s21_s8 = sshll.u32 %s419_s1, 4  ;;  %s22_s8 = int_to_ptr.hbm [resolvable:$true] %s21_s8 }
   0x3   :  { %s37_s28 = sshll.u32 %s342_s27, 4  ;;  %s343_s9 = smov [#allocation2]   ;;  %s38_s28 = int_to_ptr.vmem [resolvable:$true] %s37_s28 }
   0x4   :  { %40 = dma.hbm_to_vmem [thread:$0]  %s36_s26, 16, %s38_s28, [#allocation6]  }
   0x5   :  { %s23_s10 = sshll.u32 %s343_s9, 4  ;;  %s344_s11 = smov 64   ;;  %s24_s10 = int_to_ptr.vmem [resolvable:$true] %s23_s10 }
   0x6   :  { %s345_s12 = smov 4   ;;  %s48_s2 = sshll.u32 %s422_s4, 4  ;;  %s49_s2 = int_to_ptr.hbm [resolvable:$true] %s48_s2 }
   0x7   :  { %29 = dma.hbm_to_vmem [thread:$0]  %s22_s8, 128, %s24_s10, [#allocation3], %s344_s11, %s344_s11, %s345_s12  }
   0x8   :  { %s346_s15 = smov [#allocation7]  }
   0x9   :  { %s50_s16 = sshll.u32 %s346_s15, 4  ;;  %s51_s16 = int_to_ptr.vmem [resolvable:$true] %s50_s16 }
   0xa   :  { %53 = dma.hbm_to_vmem [thread:$0]  %s49_s2, 16, %s51_s16, [#allocation6]  }
   0xb   :  { %336 = dma.done.wait [#allocation3], 128  }
   0xc   :  { %337 = vsyncadd [#allocation3], 4294967168 }
   0xd   :  { %338 = dma.done.wait [#allocation6], 32  }
   0xe   :  { %339 = vsyncadd [#allocation6], 4294967264  ;;  %v222_v0 = vld [vmem:[#allocation2] sm:$0xff]  ;;  %vm85_vm0 = vcmask 130048   ;;  %v224_v3 = vld [vmem:[%s421_s3 + $0x8] sm:$0xff]  ;;  %vm124_vm1 = vcmask 261120  }
   0xf   :  { %v71_v1 = vld [vmem:[%s418_s0] sm:$0xf]  ;;  %96 = vmatpush.bf16.msra.mxu0 %v222_v0  ;;  %134 = vmatpush.bf16.msra.mxu1 %v224_v3  ;;  %v233_v5 = vld [vmem:[#allocation5] ss:$0 sm:$0xff]  ;;  %v234_v13 = vld [vmem:[#allocation7] ss:$0 sm:$0xff] }
  0x10   :  { %v75_v2 = vpack.c.bf16 %v71_v1, %v71_v1  ;;  %v223_v4 = vld [vmem:[%s421_s3] sm:$0xff]  ;;  %v226_v11 = vld [vmem:[%s423_s5 + $0x8] sm:$0xff]  ;;  %s347_s25 = smov [#allocation8]   ;;  %s188_s29 = sshll.u32 %s425_s7, 4  ;;  %vm179_vm2 = vcmask 60416   ;;  %s189_s29 = int_to_ptr.hbm [resolvable:$true] %s188_s29 }
  0x11   :  { %172 = vmatpush.bf16.msra.mxu2 %v226_v11  ;;  %v225_v12 = vld [vmem:[%s423_s5] sm:$0xff]  ;;  %s186_s26 = sshll.u32 %s347_s25, 4  ;;  %s187_s26 = int_to_ptr.vmem [resolvable:$true] %s186_s26 }
  0x12   :  { %203 = vmatmul.msk.bf16.vlgmr.msra.gmra.mxu0 %vm85_vm0, %v75_v2  ;;  %v235_v19 = vld [vmem:[%s424_s6] ss:$0 sm:$0xff] }
  0x13   :  { %135 = vmatpush.bf16.msra.mxu1 %v223_v4 }
  0x15   :  { %173 = vmatpush.bf16.msra.mxu2 %v225_v12 }
  0x8f   :  { %v98_v6 = vpop.f32.mrf.mxu0 }
  0x90   :  { %v99_v7 = vadd.f32 %v233_v5, %v98_v6 }
  0x92   :  { %236 = vtanh.f32 %v99_v7 }
  0x97   :  { %v100_v8 = vpop.f32.mrf.mxu0 }
  0x98   :  { %v237_v9 = vpop.eup %236 }
  0x99   :  { %v108_v10 = vpack.c.bf16 %v237_v9, %v237_v9 }
  0x9b   :  { %212 = vmatmul.msk.bf16.vlgmr.msra.gmra.mxu1 %vm124_vm1, %v108_v10 }
 0x118   :  { %v137_v14 = vpop.f32.mrf.mxu1 }
 0x119   :  { %v138_v15 = vadd.f32 %v234_v13, %v137_v14 }
 0x11b   :  { %238 = vtanh.f32 %v138_v15 }
 0x120   :  { %v139_v16 = vpop.f32.mrf.mxu1 }
 0x121   :  { %v239_v17 = vpop.eup %238 }
 0x122   :  { %v147_v18 = vpack.c.bf16 %v239_v17, %v239_v17 }
 0x124   :  { %221 = vmatmul.msk.bf16.vlgmr.msra.gmra.mxu2 %vm124_vm1, %v147_v18 }
 0x1a7   :  { %v175_v20 = vpop.f32.mrf.mxu2 }
 0x1a8   :  { %v176_v21 = vadd.f32 %v235_v19, %v175_v20 }
 0x1aa   :  { %180 = vst.msk [vmem:[#allocation8] sm:$0xf] %vm179_vm2, %v176_v21 }
 0x1ab   :  { %191 = dma.vmem_to_hbm [thread:$0]  %s187_s26, 64, %s189_s29, [#allocation4]  }
 0x1af   :  { %v177_v22 = vpop.f32.mrf.mxu2 }
 0x1b0   :  { %340 = dma.done.wait [#allocation4], 64  }
 0x1b1   :  { %341 = vsyncadd [#allocation4], 4294967232 }
 0x1b2   :  { %196 = vsyncpa [#allocation3], 1 }
 0x1b3   :  { %197 = vsyncpa [#allocation6], 1 }
 0x1b4   :  { %198 = vsyncpa [#allocation4], 1 }

// kernel: tpu_custom_call.1
= control target key start
LH: loop header
LB: loop body
LE: loop exit
PB: predicated region body
PF: predicated region fallthrough
CT: control target
= control target key end

     0   :  { %12 = vsyncpa [#allocation3], 0  ;;  %s418_s0 = inlined_call_operand.vmem [shape: f32[4,16], index: 0, kind: input, shape index: {}]   ;;  %s419_s1 = inlined_call_operand.hbm [shape: bf16[16,32], index: 1, kind: input, shape index: {}]   ;;  %s420_s2 = inlined_call_operand.hbm [shape: f32[1,32], index: 2, kind: input, shape index: {}]   ;;  %s421_s3 = inlined_call_operand.vmem [shape: bf16[32,32], index: 3, kind: input, shape index: {}]   ;;  %s422_s4 = inlined_call_operand.hbm [shape: f32[1,32], index: 4, kind: input, shape index: {}]   ;;  %s423_s5 = inlined_call_operand.vmem [shape: bf16[32,8], index: 5, kind: input, shape index: {}]   ;;  %s424_s6 = inlined_call_operand.vmem [shape: f32[1,8], index: 6, kind: input, shape index: {}]   ;;  %s425_s7 = inlined_call_operand.hbm [shape: f32[4,8], index: 7, kind: output, shape index: {}]  }
   0x1   :  { %13 = vsyncpa [#allocation6], 0  ;;  %s35_s26 = sshll.u32 %s420_s2, 4  ;;  %s36_s26 = int_to_ptr.hbm [resolvable:$true] %s35_s26 }
   0x2   :  { %14 = vsyncpa [#allocation4], 0  ;;  %s342_s27 = smov [#allocation5]   ;;  %s21_s8 = sshll.u32 %s419_s1, 4  ;;  %s22_s8 = int_to_ptr.hbm [resolvable:$true] %s21_s8 }
   0x3   :  { %s37_s28 = sshll.u32 %s342_s27, 4  ;;  %s343_s9 = smov [#allocation2]   ;;  %s38_s28 = int_to_ptr.vmem [resolvable:$true] %s37_s28 }
   0x4   :  { %40 = dma.hbm_to_vmem [thread:$0]  %s36_s26, 16, %s38_s28, [#allocation6]  }
   0x5   :  { %s23_s10 = sshll.u32 %s343_s9, 4  ;;  %s344_s11 = smov 64   ;;  %s24_s10 = int_to_ptr.vmem [resolvable:$true] %s23_s10 }
   0x6   :  { %s345_s12 = smov 4   ;;  %s48_s2 = sshll.u32 %s422_s4, 4  ;;  %s49_s2 = int_to_ptr.hbm [resolvable:$true] %s48_s2 }
   0x7   :  { %29 = dma.hbm_to_vmem [thread:$0]  %s22_s8, 128, %s24_s10, [#allocation3], %s344_s11, %s344_s11, %s345_s12  }
   0x8   :  { %s346_s15 = smov [#allocation7]  }
   0x9   :  { %s50_s16 = sshll.u32 %s346_s15, 4  ;;  %s51_s16 = int_to_ptr.vmem [resolvable:$true] %s50_s16 }
   0xa   :  { %53 = dma.hbm_to_vmem [thread:$0]  %s49_s2, 16, %s51_s16, [#allocation6]  }
   0xb   :  { %336 = dma.done.wait [#allocation3], 128  }
   0xc   :  { %337 = vsyncadd [#allocation3], 4294967168 }
   0xd   :  { %338 = dma.done.wait [#allocation6], 32  }
   0xe   :  { %339 = vsyncadd [#allocation6], 4294967264  ;;  %v222_v0 = vld [vmem:[#allocation2] sm:$0xff]  ;;  %vm85_vm0 = vcmask 130048   ;;  %v224_v3 = vld [vmem:[%s421_s3 + $0x8] sm:$0xff]  ;;  %vm124_vm1 = vcmask 261120  }
   0xf   :  { %v71_v1 = vld [vmem:[%s418_s0] sm:$0xf]  ;;  %96 = vmatpush.bf16.msra.mxu0 %v222_v0  ;;  %134 = vmatpush.bf16.msra.mxu1 %v224_v3  ;;  %v233_v5 = vld [vmem:[#allocation5] ss:$0 sm:$0xff]  ;;  %v234_v13 = vld [vmem:[#allocation7] ss:$0 sm:$0xff] }
  0x10   :  { %v75_v2 = vpack.c.bf16 %v71_v1, %v71_v1  ;;  %v223_v4 = vld [vmem:[%s421_s3] sm:$0xff]  ;;  %v226_v11 = vld [vmem:[%s423_s5 + $0x8] sm:$0xff]  ;;  %s347_s25 = smov [#allocation8]   ;;  %s188_s29 = sshll.u32 %s425_s7, 4  ;;  %vm179_vm2 = vcmask 60416   ;;  %s189_s29 = int_to_ptr.hbm [resolvable:$true] %s188_s29 }
  0x11   :  { %172 = vmatpush.bf16.msra.mxu2 %v226_v11  ;;  %v225_v12 = vld [vmem:[%s423_s5] sm:$0xff]  ;;  %s186_s26 = sshll.u32 %s347_s25, 4  ;;  %s187_s26 = int_to_ptr.vmem [resolvable:$true] %s186_s26 }
  0x12   :  { %203 = vmatmul.msk.bf16.vlgmr.msra.gmra.mxu0 %vm85_vm0, %v75_v2  ;;  %v235_v19 = vld [vmem:[%s424_s6] ss:$0 sm:$0xff] }
  0x13   :  { %135 = vmatpush.bf16.msra.mxu1 %v223_v4 }
  0x15   :  { %173 = vmatpush.bf16.msra.mxu2 %v225_v12 }
  0x8f   :  { %v98_v6 = vpop.f32.mrf.mxu0 }
  0x90   :  { %v99_v7 = vadd.f32 %v233_v5, %v98_v6 }
  0x92   :  { %236 = vtanh.f32 %v99_v7 }
  0x97   :  { %v100_v8 = vpop.f32.mrf.mxu0 }
  0x98   :  { %v237_v9 = vpop.eup %236 }
  0x99   :  { %v108_v10 = vpack.c.bf16 %v237_v9, %v237_v9 }
  0x9b   :  { %212 = vmatmul.msk.bf16.vlgmr.msra.gmra.mxu1 %vm124_vm1, %v108_v10 }
 0x118   :  { %v137_v14 = vpop.f32.mrf.mxu1 }
 0x119   :  { %v138_v15 = vadd.f32 %v234_v13, %v137_v14 }
 0x11b   :  { %238 = vtanh.f32 %v138_v15 }
 0x120   :  { %v139_v16 = vpop.f32.mrf.mxu1 }
 0x121   :  { %v239_v17 = vpop.eup %238 }
 0x122   :  { %v147_v18 = vpack.c.bf16 %v239_v17, %v239_v17 }
 0x124   :  { %221 = vmatmul.msk.bf16.vlgmr.msra.gmra.mxu2 %vm124_vm1, %v147_v18 }
 0x1a7   :  { %v175_v20 = vpop.f32.mrf.mxu2 }
 0x1a8   :  { %v176_v21 = vadd.f32 %v235_v19, %v175_v20 }
 0x1aa   :  { %180 = vst.msk [vmem:[#allocation8] sm:$0xf] %vm179_vm2, %v176_v21 }
 0x1ab   :  { %191 = dma.vmem_to_hbm [thread:$0]  %s187_s26, 64, %s189_s29, [#allocation4]  }
 0x1af   :  { %v177_v22 = vpop.f32.mrf.mxu2 }
 0x1b0   :  { %340 = dma.done.wait [#allocation4], 64  }
 0x1b1   :  { %341 = vsyncadd [#allocation4], 4294967232 }
 0x1b2   :  { %196 = vsyncpa [#allocation3], 1 }
 0x1b3   :  { %197 = vsyncpa [#allocation6], 1 }
 0x1b4   :  { %198 = vsyncpa [#allocation4], 1 }

</bundles_post_ra>
